<compile_context>
chip_gen: v5e
topology: v5e:2x2
jax: 0.10.0
libtpu: 0.0.40
codegen_flags: <defaults>
</compile_context>

<pallas_src>
import numpy as np
import jax
import jax.numpy as jnp
from jax import lax
from jax.experimental import pallas as pl
from jax.experimental.pallas import tpu as pltpu


# ---------------------------------------------------------------------------
# Kernel: entire stem for one image per grid step.
# ---------------------------------------------------------------------------
def conv_stem_kernel(x_ref, r1_ref, n1_ref, s1_ref, b1_ref,
                     r2_ref, n2_ref, s2_ref, b2_ref,
                     w3_ref, b3_ref, o_ref):
    x = x_ref[0]                                            # (H, W*Cin) bf16

    # Stage 1: Conv2d(Cin->C1, 3x3, s2, p1, bias=False) + BN + ReLU.
    acc = jnp.zeros((r1_ref.shape[1], n1_ref.shape[2]), jnp.float32)
    for kh in range(3):
        rows = jnp.dot(r1_ref[kh], x, preferred_element_type=jnp.float32)
        acc += jnp.dot(rows.astype(jnp.bfloat16), n1_ref[kh],
                       preferred_element_type=jnp.float32)
    y1 = jnp.maximum(acc * s1_ref[...] + b1_ref[...], 0.0)
    y1 = y1.astype(jnp.bfloat16)                            # (Ho1, Wo1*C1)

    # Stage 2: Conv2d(C1->C2, 3x3, s2, p1, bias=False) + BN + ReLU.
    acc = jnp.zeros((r2_ref.shape[1], n2_ref.shape[2]), jnp.float32)
    for kh in range(3):
        rows = jnp.dot(r2_ref[kh], y1, preferred_element_type=jnp.float32)
        acc += jnp.dot(rows.astype(jnp.bfloat16), n2_ref[kh],
                       preferred_element_type=jnp.float32)
    y2 = jnp.maximum(acc * s2_ref[...] + b2_ref[...], 0.0)
    y2 = y2.astype(jnp.bfloat16)                            # (Ho2, Wo2*C2)

    # Stage 3: Conv2d(C2->E, 1x1, bias=True) via block-diagonal weights.
    y3 = jnp.dot(y2, w3_ref[...], preferred_element_type=jnp.float32)
    o_ref[0] = (y3 + b3_ref[...]).astype(o_ref.dtype)       # (Ho2, Wo2*E) lane-dense


# ---------------------------------------------------------------------------
# Host-side (one-time) construction of the decimation / weight matrices.
# ---------------------------------------------------------------------------
def _decimation_rows(h_in, h_out):
    """R[kh] (h_out, h_in): picks input row 2*oh + kh - 1 (zero row if padded)."""
    r = np.zeros((3, h_out, h_in), np.float32)
    for kh in range(3):
        for oh in range(h_out):
            ih = 2 * oh + kh - 1
            if 0 <= ih < h_in:
                r[kh, oh, ih] = 1.0
    return r


def _decimation_weights(w_hwio, w_in, w_out):
    """N[kh] (w_in*Cin, w_out*Cout): stride-2 column window + channel contraction."""
    _, _, cin, cout = w_hwio.shape
    w_np = np.asarray(w_hwio, np.float32)
    n = np.zeros((3, w_in * cin, w_out * cout), np.float32)
    for kh in range(3):
        for ow in range(w_out):
            for kw in range(3):
                iw = 2 * ow + kw - 1
                if 0 <= iw < w_in:
                    n[kh, iw * cin:(iw + 1) * cin,
                      ow * cout:(ow + 1) * cout] = w_np[kh, kw]
    return n


def _block_diag(w, reps):
    """(reps*Cin, reps*Cout) block-diagonal replication of a (Cin, Cout) matrix."""
    cin, cout = w.shape
    w_np = np.asarray(w, np.float32)
    m = np.zeros((reps * cin, reps * cout), np.float32)
    for i in range(reps):
        m[i * cin:(i + 1) * cin, i * cout:(i + 1) * cout] = w_np
    return m


def init_raw_params(key, embed_dim=32, in_chans=3):
    assert embed_dim % 8 == 0
    c1, c2 = embed_dim // 8, embed_dim // 4
    ks = jax.random.split(key, 12)

    def _bn_fold(kg, kb, km, kv, c, eps=1e-5):
        gamma = 1.0 + 0.1 * jax.random.normal(kg, (c,), jnp.float32)
        beta = 0.1 * jax.random.normal(kb, (c,), jnp.float32)
        mean = 0.1 * jax.random.normal(km, (c,), jnp.float32)
        var = jnp.abs(jax.random.normal(kv, (c,), jnp.float32)) + 0.5
        scale = gamma / jnp.sqrt(var + eps)
        return scale, beta - mean * scale

    w1 = 0.1 * jax.random.normal(ks[0], (3, 3, in_chans, c1), jnp.float32)   # HWIO
    s1, b1 = _bn_fold(ks[1], ks[2], ks[3], ks[4], c1)
    w2 = 0.1 * jax.random.normal(ks[5], (3, 3, c1, c2), jnp.float32)         # HWIO
    s2, b2 = _bn_fold(ks[6], ks[7], ks[8], ks[9], c2)
    w3 = 0.1 * jax.random.normal(ks[10], (c2, embed_dim), jnp.float32)       # 1x1 conv
    b3 = 0.1 * jax.random.normal(ks[11], (embed_dim,), jnp.float32)
    return dict(w1=w1, bn1_scale=s1, bn1_bias=b1,
                w2=w2, bn2_scale=s2, bn2_bias=b2, w3=w3, b3=b3)


def prepare_kernel_params(raw, img_hw):
    H, W = img_hw
    c1, c2, e = raw['w1'].shape[3], raw['w2'].shape[3], raw['w3'].shape[1]
    ho1, wo1 = H // 2, W // 2
    ho2, wo2 = ho1 // 2, wo1 // 2
    bf = jnp.bfloat16
    return {
        'r1': jnp.asarray(_decimation_rows(H, ho1), bf),
        'n1': jnp.asarray(_decimation_weights(raw['w1'], W, wo1), bf),
        's1': jnp.tile(raw['bn1_scale'], wo1).reshape(1, wo1 * c1),
        'b1': jnp.tile(raw['bn1_bias'], wo1).reshape(1, wo1 * c1),
        'r2': jnp.asarray(_decimation_rows(ho1, ho2), bf),
        'n2': jnp.asarray(_decimation_weights(raw['w2'], wo1, wo2), bf),
        's2': jnp.tile(raw['bn2_scale'], wo2).reshape(1, wo2 * c2),
        'b2': jnp.tile(raw['bn2_bias'], wo2).reshape(1, wo2 * c2),
        'w3': jnp.asarray(_block_diag(raw['w3'], wo2), bf),
        'b3': jnp.tile(raw['b3'], wo2).reshape(1, wo2 * e),
    }


# ---------------------------------------------------------------------------
# Forward: one fused pallas_call, gridded over batch.
# ---------------------------------------------------------------------------
@jax.jit
def conv_stem_forward(x_nchw, kp):
    B, C, H, W = x_nchw.shape
    ho2, wo2 = H // 4, W // 4
    wo2e = kp['b3'].shape[1]                 # Wo2 * embed_dim (lane-dense: 128)
    embed_dim = wo2e // wo2

    # NCHW -> NHWC -> (B, H, W*C): pure layout plumbing, 1x activation traffic.
    x2 = jnp.transpose(x_nchw, (0, 2, 3, 1)).reshape(B, H, W * C)
    x2 = x2.astype(jnp.bfloat16)

    def full(a):
        return pl.BlockSpec(a.shape, lambda b, _nd=a.ndim: (0,) * _nd)

    out = pl.pallas_call(
        conv_stem_kernel,
        out_shape=jax.ShapeDtypeStruct((B, ho2, wo2e), jnp.float32),
        grid=(B,),
        in_specs=[
            pl.BlockSpec((1, H, W * C), lambda b: (b, 0, 0)),
            full(kp['r1']), full(kp['n1']), full(kp['s1']), full(kp['b1']),
            full(kp['r2']), full(kp['n2']), full(kp['s2']), full(kp['b2']),
            full(kp['w3']), full(kp['b3']),
        ],
        out_specs=pl.BlockSpec((1, ho2, wo2e), lambda b: (b, 0, 0)),
        compiler_params=pltpu.CompilerParams(
            dimension_semantics=("parallel",),
            vmem_limit_bytes=32 * 1024 * 1024),
    )(x2, kp['r1'], kp['n1'], kp['s1'], kp['b1'],
      kp['r2'], kp['n2'], kp['s2'], kp['b2'], kp['w3'], kp['b3'])

    # (B, Ho2, Wo2*E) -> (B, Ho2*Wo2, E): contiguous reshape
    # == flatten(2).transpose(1, 2) of the NCHW reference; norm = Identity.
    return out.reshape(B, ho2 * wo2, embed_dim)


# ---------------------------------------------------------------------------
# Pure-JAX f32 reference (for a correctness check in __main__).
# ---------------------------------------------------------------------------
def conv_stem_reference(x_nchw, raw):
    x = jnp.transpose(x_nchw, (0, 2, 3, 1))
    dn = ('NHWC', 'HWIO', 'NHWC')
    y = lax.conv_general_dilated(x, raw['w1'], (2, 2), ((1, 1), (1, 1)),
                                 dimension_numbers=dn,
                                 precision=lax.Precision.HIGHEST)
    y = jnp.maximum(y * raw['bn1_scale'] + raw['bn1_bias'], 0.0)
    y = lax.conv_general_dilated(y, raw['w2'], (2, 2), ((1, 1), (1, 1)),
                                 dimension_numbers=dn,
                                 precision=lax.Precision.HIGHEST)
    y = jnp.maximum(y * raw['bn2_scale'] + raw['bn2_bias'], 0.0)
    y = jnp.einsum('bhwc,ce->bhwe', y, raw['w3'],
                   precision=lax.Precision.HIGHEST) + raw['b3']
    B, Ho, Wo, E = y.shape
    return y.reshape(B, Ho * Wo, E)


if __name__ == "__main__":
    key = jax.random.PRNGKey(0)
    kx, kw = jax.random.split(key)
    # img_size=16, patch_size=4, in_chans=3, embed_dim=32 -> 16 patches of dim 32
    B, C, H, W = 2, 3, 16, 16
    embed_dim = 32
    x = jax.random.normal(kx, (B, C, H, W), jnp.float32)

    raw = init_raw_params(kw, embed_dim=embed_dim, in_chans=C)
    kparams = prepare_kernel_params(raw, (H, W))

    out = jax.block_until_ready(conv_stem_forward(x, kparams))
    assert out.shape == (B, (H // 4) * (W // 4), embed_dim), out.shape
    assert out.dtype == jnp.float32

    ref = jax.block_until_ready(conv_stem_reference(x, raw))
    np.testing.assert_allclose(np.asarray(out), np.asarray(ref),
                               rtol=5e-2, atol=5e-2)
    print("KERNEL_OK")
</pallas_src>

<mosaic_0001>
module attributes {stable_mosaic.version = 11 : i64} {
  func.func @conv_stem_kernel(%arg0: i32, %arg1: memref<1x16x48xbf16, #tpu.memory_space<vmem>>, %arg2: memref<3x8x16xbf16, #tpu.memory_space<vmem>>, %arg3: memref<3x48x32xbf16, #tpu.memory_space<vmem>>, %arg4: memref<1x32xf32, #tpu.memory_space<vmem>>, %arg5: memref<1x32xf32, #tpu.memory_space<vmem>>, %arg6: memref<3x4x8xbf16, #tpu.memory_space<vmem>>, %arg7: memref<3x32x32xbf16, #tpu.memory_space<vmem>>, %arg8: memref<1x32xf32, #tpu.memory_space<vmem>>, %arg9: memref<1x32xf32, #tpu.memory_space<vmem>>, %arg10: memref<32x128xbf16, #tpu.memory_space<vmem>>, %arg11: memref<1x128xf32, #tpu.memory_space<vmem>>, %arg12: memref<1x4x128xf32, #tpu.memory_space<vmem>>) attributes {dimension_semantics = [#tpu.dimension_semantics<parallel>], iteration_bounds = array<i64: 2>, scalar_prefetch = 0 : i64, scratch_operands = 0 : i64, tpu.core_type = #tpu.core_type<tc>, window_params = [{transform_indices = @transform_0, window_bounds = array<i64: 1, 16, 48>}, {pipeline_mode = #tpu.pipeline_mode<synchronous>, transform_indices = @transform_1, window_bounds = array<i64: 3, 8, 16>}, {pipeline_mode = #tpu.pipeline_mode<synchronous>, transform_indices = @transform_2, window_bounds = array<i64: 3, 48, 32>}, {pipeline_mode = #tpu.pipeline_mode<synchronous>, transform_indices = @transform_3, window_bounds = array<i64: 1, 32>}, {pipeline_mode = #tpu.pipeline_mode<synchronous>, transform_indices = @transform_4, window_bounds = array<i64: 1, 32>}, {pipeline_mode = #tpu.pipeline_mode<synchronous>, transform_indices = @transform_5, window_bounds = array<i64: 3, 4, 8>}, {pipeline_mode = #tpu.pipeline_mode<synchronous>, transform_indices = @transform_6, window_bounds = array<i64: 3, 32, 32>}, {pipeline_mode = #tpu.pipeline_mode<synchronous>, transform_indices = @transform_7, window_bounds = array<i64: 1, 32>}, {pipeline_mode = #tpu.pipeline_mode<synchronous>, transform_indices = @transform_8, window_bounds = array<i64: 1, 32>}, {pipeline_mode = #tpu.pipeline_mode<synchronous>, transform_indices = @transform_9, window_bounds = array<i64: 32, 128>}, {pipeline_mode = #tpu.pipeline_mode<synchronous>, transform_indices = @transform_10, window_bounds = array<i64: 1, 128>}, {transform_indices = @transform_11, window_bounds = array<i64: 1, 4, 128>}]} {
    %c0 = arith.constant 0 : index
    %c0_0 = arith.constant 0 : index
    %c0_1 = arith.constant 0 : index
    %0 = vector.load %arg1[%c0, %c0_0, %c0_1] : memref<1x16x48xbf16, #tpu.memory_space<vmem>>, vector<1x16x48xbf16>
    %1 = vector.shape_cast %0 : vector<1x16x48xbf16> to vector<16x48xbf16>
    %cst = arith.constant 0.000000e+00 : f32
    %2 = vector.broadcast %cst : f32 to vector<8x32xf32>
    %c0_2 = arith.constant 0 : index
    %c0_3 = arith.constant 0 : index
    %c0_4 = arith.constant 0 : index
    %3 = vector.load %arg2[%c0_2, %c0_3, %c0_4] : memref<3x8x16xbf16, #tpu.memory_space<vmem>>, vector<1x8x16xbf16>
    %4 = vector.shape_cast %3 : vector<1x8x16xbf16> to vector<8x16xbf16>
    %cst_5 = arith.constant dense<0.000000e+00> : vector<8x48xf32>
    %5 = tpu.matmul %4, %1, %cst_5 {dimension_numbers = #tpu.dot_dimension_numbers<[1], [0], [0], [1], [0, 0, 1, 1], [], []>} : vector<8x16xbf16>, vector<16x48xbf16>, vector<8x48xf32> -> vector<8x48xf32>
    %6 = arith.truncf %5 : vector<8x48xf32> to vector<8x48xbf16>
    %c0_6 = arith.constant 0 : index
    %c0_7 = arith.constant 0 : index
    %c0_8 = arith.constant 0 : index
    %7 = vector.load %arg3[%c0_6, %c0_7, %c0_8] : memref<3x48x32xbf16, #tpu.memory_space<vmem>>, vector<1x48x32xbf16>
    %8 = vector.shape_cast %7 : vector<1x48x32xbf16> to vector<48x32xbf16>
    %cst_9 = arith.constant dense<0.000000e+00> : vector<8x32xf32>
    %9 = tpu.matmul %6, %8, %cst_9 {dimension_numbers = #tpu.dot_dimension_numbers<[1], [0], [0], [1], [0, 0, 1, 1], [], []>} : vector<8x48xbf16>, vector<48x32xbf16>, vector<8x32xf32> -> vector<8x32xf32>
    %10 = arith.addf %2, %9 : vector<8x32xf32>
    %c1 = arith.constant 1 : index
    %c0_10 = arith.constant 0 : index
    %c0_11 = arith.constant 0 : index
    %11 = vector.load %arg2[%c1, %c0_10, %c0_11] : memref<3x8x16xbf16, #tpu.memory_space<vmem>>, vector<1x8x16xbf16>
    %12 = vector.shape_cast %11 : vector<1x8x16xbf16> to vector<8x16xbf16>
    %cst_12 = arith.constant dense<0.000000e+00> : vector<8x48xf32>
    %13 = tpu.matmul %12, %1, %cst_12 {dimension_numbers = #tpu.dot_dimension_numbers<[1], [0], [0], [1], [0, 0, 1, 1], [], []>} : vector<8x16xbf16>, vector<16x48xbf16>, vector<8x48xf32> -> vector<8x48xf32>
    %14 = arith.truncf %13 : vector<8x48xf32> to vector<8x48xbf16>
    %c1_13 = arith.constant 1 : index
    %c0_14 = arith.constant 0 : index
    %c0_15 = arith.constant 0 : index
    %15 = vector.load %arg3[%c1_13, %c0_14, %c0_15] : memref<3x48x32xbf16, #tpu.memory_space<vmem>>, vector<1x48x32xbf16>
    %16 = vector.shape_cast %15 : vector<1x48x32xbf16> to vector<48x32xbf16>
    %cst_16 = arith.constant dense<0.000000e+00> : vector<8x32xf32>
    %17 = tpu.matmul %14, %16, %cst_16 {dimension_numbers = #tpu.dot_dimension_numbers<[1], [0], [0], [1], [0, 0, 1, 1], [], []>} : vector<8x48xbf16>, vector<48x32xbf16>, vector<8x32xf32> -> vector<8x32xf32>
    %18 = arith.addf %10, %17 : vector<8x32xf32>
    %c2 = arith.constant 2 : index
    %c0_17 = arith.constant 0 : index
    %c0_18 = arith.constant 0 : index
    %19 = vector.load %arg2[%c2, %c0_17, %c0_18] : memref<3x8x16xbf16, #tpu.memory_space<vmem>>, vector<1x8x16xbf16>
    %20 = vector.shape_cast %19 : vector<1x8x16xbf16> to vector<8x16xbf16>
    %cst_19 = arith.constant dense<0.000000e+00> : vector<8x48xf32>
    %21 = tpu.matmul %20, %1, %cst_19 {dimension_numbers = #tpu.dot_dimension_numbers<[1], [0], [0], [1], [0, 0, 1, 1], [], []>} : vector<8x16xbf16>, vector<16x48xbf16>, vector<8x48xf32> -> vector<8x48xf32>
    %22 = arith.truncf %21 : vector<8x48xf32> to vector<8x48xbf16>
    %c2_20 = arith.constant 2 : index
    %c0_21 = arith.constant 0 : index
    %c0_22 = arith.constant 0 : index
    %23 = vector.load %arg3[%c2_20, %c0_21, %c0_22] : memref<3x48x32xbf16, #tpu.memory_space<vmem>>, vector<1x48x32xbf16>
    %24 = vector.shape_cast %23 : vector<1x48x32xbf16> to vector<48x32xbf16>
    %cst_23 = arith.constant dense<0.000000e+00> : vector<8x32xf32>
    %25 = tpu.matmul %22, %24, %cst_23 {dimension_numbers = #tpu.dot_dimension_numbers<[1], [0], [0], [1], [0, 0, 1, 1], [], []>} : vector<8x48xbf16>, vector<48x32xbf16>, vector<8x32xf32> -> vector<8x32xf32>
    %26 = arith.addf %18, %25 : vector<8x32xf32>
    %c0_24 = arith.constant 0 : index
    %c0_25 = arith.constant 0 : index
    %27 = vector.load %arg4[%c0_24, %c0_25] : memref<1x32xf32, #tpu.memory_space<vmem>>, vector<1x32xf32>
    %28 = vector.broadcast %27 : vector<1x32xf32> to vector<8x32xf32>
    %29 = arith.mulf %26, %28 : vector<8x32xf32>
    %c0_26 = arith.constant 0 : index
    %c0_27 = arith.constant 0 : index
    %30 = vector.load %arg5[%c0_26, %c0_27] : memref<1x32xf32, #tpu.memory_space<vmem>>, vector<1x32xf32>
    %31 = vector.broadcast %30 : vector<1x32xf32> to vector<8x32xf32>
    %32 = arith.addf %29, %31 : vector<8x32xf32>
    %cst_28 = arith.constant 0.000000e+00 : f32
    %33 = vector.broadcast %cst_28 : f32 to vector<8x32xf32>
    %34 = arith.maximumf %32, %33 : vector<8x32xf32>
    %35 = arith.truncf %34 : vector<8x32xf32> to vector<8x32xbf16>
    %cst_29 = arith.constant 0.000000e+00 : f32
    %36 = vector.broadcast %cst_29 : f32 to vector<4x32xf32>
    %c0_30 = arith.constant 0 : index
    %c0_31 = arith.constant 0 : index
    %c0_32 = arith.constant 0 : index
    %37 = vector.load %arg6[%c0_30, %c0_31, %c0_32] : memref<3x4x8xbf16, #tpu.memory_space<vmem>>, vector<1x4x8xbf16>
    %38 = vector.shape_cast %37 : vector<1x4x8xbf16> to vector<4x8xbf16>
    %cst_33 = arith.constant dense<0.000000e+00> : vector<4x32xf32>
    %39 = tpu.matmul %38, %35, %cst_33 {dimension_numbers = #tpu.dot_dimension_numbers<[1], [0], [0], [1], [0, 0, 1, 1], [], []>} : vector<4x8xbf16>, vector<8x32xbf16>, vector<4x32xf32> -> vector<4x32xf32>
    %40 = arith.truncf %39 : vector<4x32xf32> to vector<4x32xbf16>
    %c0_34 = arith.constant 0 : index
    %c0_35 = arith.constant 0 : index
    %c0_36 = arith.constant 0 : index
    %41 = vector.load %arg7[%c0_34, %c0_35, %c0_36] : memref<3x32x32xbf16, #tpu.memory_space<vmem>>, vector<1x32x32xbf16>
    %42 = vector.shape_cast %41 : vector<1x32x32xbf16> to vector<32x32xbf16>
    %cst_37 = arith.constant dense<0.000000e+00> : vector<4x32xf32>
    %43 = tpu.matmul %40, %42, %cst_37 {dimension_numbers = #tpu.dot_dimension_numbers<[1], [0], [0], [1], [0, 0, 1, 1], [], []>} : vector<4x32xbf16>, vector<32x32xbf16>, vector<4x32xf32> -> vector<4x32xf32>
    %44 = arith.addf %36, %43 : vector<4x32xf32>
    %c1_38 = arith.constant 1 : index
    %c0_39 = arith.constant 0 : index
    %c0_40 = arith.constant 0 : index
    %45 = vector.load %arg6[%c1_38, %c0_39, %c0_40] : memref<3x4x8xbf16, #tpu.memory_space<vmem>>, vector<1x4x8xbf16>
    %46 = vector.shape_cast %45 : vector<1x4x8xbf16> to vector<4x8xbf16>
    %cst_41 = arith.constant dense<0.000000e+00> : vector<4x32xf32>
    %47 = tpu.matmul %46, %35, %cst_41 {dimension_numbers = #tpu.dot_dimension_numbers<[1], [0], [0], [1], [0, 0, 1, 1], [], []>} : vector<4x8xbf16>, vector<8x32xbf16>, vector<4x32xf32> -> vector<4x32xf32>
    %48 = arith.truncf %47 : vector<4x32xf32> to vector<4x32xbf16>
    %c1_42 = arith.constant 1 : index
    %c0_43 = arith.constant 0 : index
    %c0_44 = arith.constant 0 : index
    %49 = vector.load %arg7[%c1_42, %c0_43, %c0_44] : memref<3x32x32xbf16, #tpu.memory_space<vmem>>, vector<1x32x32xbf16>
    %50 = vector.shape_cast %49 : vector<1x32x32xbf16> to vector<32x32xbf16>
    %cst_45 = arith.constant dense<0.000000e+00> : vector<4x32xf32>
    %51 = tpu.matmul %48, %50, %cst_45 {dimension_numbers = #tpu.dot_dimension_numbers<[1], [0], [0], [1], [0, 0, 1, 1], [], []>} : vector<4x32xbf16>, vector<32x32xbf16>, vector<4x32xf32> -> vector<4x32xf32>
    %52 = arith.addf %44, %51 : vector<4x32xf32>
    %c2_46 = arith.constant 2 : index
    %c0_47 = arith.constant 0 : index
    %c0_48 = arith.constant 0 : index
    %53 = vector.load %arg6[%c2_46, %c0_47, %c0_48] : memref<3x4x8xbf16, #tpu.memory_space<vmem>>, vector<1x4x8xbf16>
    %54 = vector.shape_cast %53 : vector<1x4x8xbf16> to vector<4x8xbf16>
    %cst_49 = arith.constant dense<0.000000e+00> : vector<4x32xf32>
    %55 = tpu.matmul %54, %35, %cst_49 {dimension_numbers = #tpu.dot_dimension_numbers<[1], [0], [0], [1], [0, 0, 1, 1], [], []>} : vector<4x8xbf16>, vector<8x32xbf16>, vector<4x32xf32> -> vector<4x32xf32>
    %56 = arith.truncf %55 : vector<4x32xf32> to vector<4x32xbf16>
    %c2_50 = arith.constant 2 : index
    %c0_51 = arith.constant 0 : index
    %c0_52 = arith.constant 0 : index
    %57 = vector.load %arg7[%c2_50, %c0_51, %c0_52] : memref<3x32x32xbf16, #tpu.memory_space<vmem>>, vector<1x32x32xbf16>
    %58 = vector.shape_cast %57 : vector<1x32x32xbf16> to vector<32x32xbf16>
    %cst_53 = arith.constant dense<0.000000e+00> : vector<4x32xf32>
    %59 = tpu.matmul %56, %58, %cst_53 {dimension_numbers = #tpu.dot_dimension_numbers<[1], [0], [0], [1], [0, 0, 1, 1], [], []>} : vector<4x32xbf16>, vector<32x32xbf16>, vector<4x32xf32> -> vector<4x32xf32>
    %60 = arith.addf %52, %59 : vector<4x32xf32>
    %c0_54 = arith.constant 0 : index
    %c0_55 = arith.constant 0 : index
    %61 = vector.load %arg8[%c0_54, %c0_55] : memref<1x32xf32, #tpu.memory_space<vmem>>, vector<1x32xf32>
    %62 = vector.broadcast %61 : vector<1x32xf32> to vector<4x32xf32>
    %63 = arith.mulf %60, %62 : vector<4x32xf32>
    %c0_56 = arith.constant 0 : index
    %c0_57 = arith.constant 0 : index
    %64 = vector.load %arg9[%c0_56, %c0_57] : memref<1x32xf32, #tpu.memory_space<vmem>>, vector<1x32xf32>
    %65 = vector.broadcast %64 : vector<1x32xf32> to vector<4x32xf32>
    %66 = arith.addf %63, %65 : vector<4x32xf32>
    %cst_58 = arith.constant 0.000000e+00 : f32
    %67 = vector.broadcast %cst_58 : f32 to vector<4x32xf32>
    %68 = arith.maximumf %66, %67 : vector<4x32xf32>
    %69 = arith.truncf %68 : vector<4x32xf32> to vector<4x32xbf16>
    %c0_59 = arith.constant 0 : index
    %c0_60 = arith.constant 0 : index
    %70 = vector.load %arg10[%c0_59, %c0_60] : memref<32x128xbf16, #tpu.memory_space<vmem>>, vector<32x128xbf16>
    %cst_61 = arith.constant dense<0.000000e+00> : vector<4x128xf32>
    %71 = tpu.matmul %69, %70, %cst_61 {dimension_numbers = #tpu.dot_dimension_numbers<[1], [0], [0], [1], [0, 0, 1, 1], [], []>} : vector<4x32xbf16>, vector<32x128xbf16>, vector<4x128xf32> -> vector<4x128xf32>
    %c0_62 = arith.constant 0 : index
    %c0_63 = arith.constant 0 : index
    %72 = vector.load %arg11[%c0_62, %c0_63] : memref<1x128xf32, #tpu.memory_space<vmem>>, vector<1x128xf32>
    %73 = vector.broadcast %72 : vector<1x128xf32> to vector<4x128xf32>
    %74 = arith.addf %71, %73 : vector<4x128xf32>
    %c0_64 = arith.constant 0 : index
    %c0_65 = arith.constant 0 : index
    %c0_66 = arith.constant 0 : index
    %75 = vector.load %arg12[%c0_64, %c0_65, %c0_66] : memref<1x4x128xf32, #tpu.memory_space<vmem>>, vector<1x4x128xf32>
    %76 = vector.shape_cast %75 : vector<1x4x128xf32> to vector<4x128xf32>
    %77 = vector.shape_cast %74 : vector<4x128xf32> to vector<1x4x128xf32>
    tpu.vector_store %arg12[%c0_64, %c0_65, %c0_66], %77 {strides = array<i32>} : memref<1x4x128xf32, #tpu.memory_space<vmem>>, vector<1x4x128xf32>,
    return
  }
  func.func @transform_0(%arg0: i32) -> (i32, i32, i32) {
    %c0_i32 = arith.constant 0 : i32
    %c0_i32_0 = arith.constant 0 : i32
    %c0_i32_1 = arith.constant 0 : i32
    return %arg0, %c0_i32, %c0_i32_0 : i32, i32, i32
  }
  func.func @transform_1(%arg0: i32) -> (i32, i32, i32) {
    %c0_i32 = arith.constant 0 : i32
    %c0_i32_0 = arith.constant 0 : i32
    %c0_i32_1 = arith.constant 0 : i32
    %c0_i32_2 = arith.constant 0 : i32
    return %c0_i32, %c0_i32_0, %c0_i32_1 : i32, i32, i32
  }
  func.func @transform_2(%arg0: i32) -> (i32, i32, i32) {
    %c0_i32 = arith.constant 0 : i32
    %c0_i32_0 = arith.constant 0 : i32
    %c0_i32_1 = arith.constant 0 : i32
    %c0_i32_2 = arith.constant 0 : i32
    return %c0_i32, %c0_i32_0, %c0_i32_1 : i32, i32, i32
  }
  func.func @transform_3(%arg0: i32) -> (i32, i32) {
    %c0_i32 = arith.constant 0 : i32
    %c0_i32_0 = arith.constant 0 : i32
    %c0_i32_1 = arith.constant 0 : i32
    return %c0_i32, %c0_i32_0 : i32, i32
  }
  func.func @transform_4(%arg0: i32) -> (i32, i32) {
    %c0_i32 = arith.constant 0 : i32
    %c0_i32_0 = arith.constant 0 : i32
    %c0_i32_1 = arith.constant 0 : i32
    return %c0_i32, %c0_i32_0 : i32, i32
  }
  func.func @transform_5(%arg0: i32) -> (i32, i32, i32) {
    %c0_i32 = arith.constant 0 : i32
    %c0_i32_0 = arith.constant 0 : i32
    %c0_i32_1 = arith.constant 0 : i32
    %c0_i32_2 = arith.constant 0 : i32
    return %c0_i32, %c0_i32_0, %c0_i32_1 : i32, i32, i32
  }
  func.func @transform_6(%arg0: i32) -> (i32, i32, i32) {
    %c0_i32 = arith.constant 0 : i32
    %c0_i32_0 = arith.constant 0 : i32
    %c0_i32_1 = arith.constant 0 : i32
    %c0_i32_2 = arith.constant 0 : i32
    return %c0_i32, %c0_i32_0, %c0_i32_1 : i32, i32, i32
  }
  func.func @transform_7(%arg0: i32) -> (i32, i32) {
    %c0_i32 = arith.constant 0 : i32
    %c0_i32_0 = arith.constant 0 : i32
    %c0_i32_1 = arith.constant 0 : i32
    return %c0_i32, %c0_i32_0 : i32, i32
  }
  func.func @transform_8(%arg0: i32) -> (i32, i32) {
    %c0_i32 = arith.constant 0 : i32
    %c0_i32_0 = arith.constant 0 : i32
    %c0_i32_1 = arith.constant 0 : i32
    return %c0_i32, %c0_i32_0 : i32, i32
  }
  func.func @transform_9(%arg0: i32) -> (i32, i32) {
    %c0_i32 = arith.constant 0 : i32
    %c0_i32_0 = arith.constant 0 : i32
    %c0_i32_1 = arith.constant 0 : i32
    return %c0_i32, %c0_i32_0 : i32, i32
  }
  func.func @transform_10(%arg0: i32) -> (i32, i32) {
    %c0_i32 = arith.constant 0 : i32
    %c0_i32_0 = arith.constant 0 : i32
    %c0_i32_1 = arith.constant 0 : i32
    return %c0_i32, %c0_i32_0 : i32, i32
  }
  func.func @transform_11(%arg0: i32) -> (i32, i32, i32) {
    %c0_i32 = arith.constant 0 : i32
    %c0_i32_0 = arith.constant 0 : i32
    %c0_i32_1 = arith.constant 0 : i32
    return %arg0, %c0_i32, %c0_i32_0 : i32, i32, i32
  }
}

</mosaic_0001>

<bundles_post_ra>
// kernel: conv_stem_forward.1
= control target key start
LH: loop header
LB: loop body
LE: loop exit
PB: predicated region body
PF: predicated region fallthrough
CT: control target
= control target key end

     0   :  { %s1069_s17 = smov 0   ;;  %s1178_s0 = inlined_call_operand.vmem [shape: bf16[2,16,48], index: 0, kind: input, shape index: {}]   ;;  %s1179_s1 = inlined_call_operand.vmem [shape: bf16[3,8,16], index: 1, kind: input, shape index: {}]   ;;  %s1180_s2 = inlined_call_operand.vmem [shape: bf16[3,48,32], index: 2, kind: input, shape index: {}]   ;;  %s1181_s3 = inlined_call_operand.vmem [shape: f32[1,32], index: 3, kind: input, shape index: {}]   ;;  %s1182_s4 = inlined_call_operand.vmem [shape: f32[1,32], index: 4, kind: input, shape index: {}]   ;;  %s1183_s5 = inlined_call_operand.vmem [shape: bf16[3,4,8], index: 5, kind: input, shape index: {}]   ;;  %s1184_s6 = inlined_call_operand.vmem [shape: bf16[3,32,32], index: 6, kind: input, shape index: {}]   ;;  %s1185_s7 = inlined_call_operand.vmem [shape: f32[1,32], index: 7, kind: input, shape index: {}]   ;;  %s1186_s8 = inlined_call_operand.vmem [shape: f32[1,32], index: 8, kind: input, shape index: {}]   ;;  %s1187_s9 = inlined_call_operand.vmem [shape: bf16[32,128], index: 9, kind: input, shape index: {}]   ;;  %s1188_s10 = inlined_call_operand.vmem [shape: f32[1,128], index: 10, kind: input, shape index: {}]   ;;  %s1189_s11 = inlined_call_operand.vmem [shape: f32[2,4,128], index: 11, kind: output, shape index: {}]  }
   0x1 LB: > { %s850_s18 = sadd.s32 4294967295, %s1007_s17   ;;  %p854_p0 = scmp.ge.s32.totalorder %s1007_s17, 1  ;;  %s1007_s17 = sphi %s1069_s17, %s21_s17  }
   0x2   : > { %p337_p1 = scmp.lt.s32.totalorder %s1007_s17, 3 }
   0x4   : > { %p338_p2 = pnand %p854_p0, %p337_p1 }
   0x5   : > { %p376_p3 = scmp.lt.s32.totalorder (!%p338_p2), %s850_s18, 1 }
   0x6   : > { %341 = sbr.rel (%p338_p2) target bundleno = 728 (0x2d8), region = 64 }
   0xb   : > { %v976_v0 = vld [vmem:[%s1180_s2 + $0x28] sm:$0xff]  ;;  %v973_v1 = vld [vmem:[%s1180_s2 + $0x10] sm:$0xff]  ;;  %s1191_s18 = smov (!%p376_p3, %s850_s18), 1  ;;  %v975_v2 = vld [vmem:[%s1180_s2 + $0x20] sm:$0xff]  ;;  %vm395_vm0 = vcmask 130048   ;;  %vm463_vm1 = vcmask 392192  }
   0xc   : > { %v972_v3 = vld [vmem:[%s1180_s2 + $0x8] sm:$0xff]  ;;  %472 = vmatpush.bf16.msra.mxu2 %v976_v0  ;;  %506 = vmatpush.bf16.msra.mxu3 %v973_v1  ;;  %s969_s27 = sshll.u32 %s1191_s18, 3  ;;  %v388_v5 = vld [vmem:[%s1179_s1] sm:$0xf]  ;;  %v863_v6 = vld [vmem:[%s1179_s1 + $0x4] sm:$0xf] }
   0xd   : > { %s380_s30 = scalar_lea.vmem %s1178_s0, %s969_s27  ;;  %v897_v7 = vld [vmem:[%s1179_s1 + $0x8] sm:$0xf]  ;;  %v974_v8 = vld [vmem:[%s1180_s2 + $0x18] sm:$0xff]  ;;  %v971_v9 = vld [vmem:[%s1180_s2] sm:$0xff]  ;;  %vm592_vm2 = vcmask 1043456   ;;  %vm588_vm3 = vcmask 64512  }
   0xe   : > { %v970_v4 = vld [vmem:[%s380_s30] sm:$0xff]  ;;  %v978_v11 = vld [vmem:[%s1180_s2 + $0x38] sm:$0xff]  ;;  %v977_v12 = vld [vmem:[%s1180_s2 + $0x30] sm:$0xff]  ;;  %vm650_vm4 = vcmask 261120   ;;  %s857_s26 = sshll.u32 %s1191_s18, 2 }
   0xf   : > { %406 = vmatpush.bf16.msra.mxu0 %v970_v4  ;;  %431 = vmatpush.bf16.msra.mxu1 %v970_v4  ;;  %v979_v10 = vld [vmem:[%s1180_s2 + $0x40] sm:$0xff]  ;;  %v981_v40 = vld [vmem:[%s1184_s6 + $0x8] sm:$0xff]  ;;  %v983_v41 = vld [vmem:[%s1184_s6 + $0x18] sm:$0xff]  ;;  %s384_s12 = scalar_lea.vmem %s1189_s11, %s857_s26 }
  0x10   : > { %473 = vmatpush.bf16.msra.mxu2 %v975_v2  ;;  %507 = vmatpush.bf16.msra.mxu3 %v972_v3  ;;  %v996_v27 = vld [vmem:[%s1181_s3] ss:$0 sm:$0xff]  ;;  %v919_v38 = vld [vmem:[%s1183_s5 + $0x2] sm:$0x3]  ;;  %v943_v39 = vld [vmem:[%s1183_s5 + $0x4] sm:$0x3] }
  0x11   : > { %v997_v30 = vld [vmem:[%s1182_s4] ss:$0 sm:$0xff]  ;;  %v982_v43 = vld [vmem:[%s1184_s6 + $0x10] sm:$0xff]  ;;  %v985_v44 = vld [vmem:[%s1184_s6 + $0x28] sm:$0xff] }
  0x12   : > { %862 = vmatmul.msk.bf16.vlgmr.msra.gmra.mxu0 %vm395_vm0, %v388_v5  ;;  %864 = vmatmul.msk.bf16.vlgmr.msra.gmra.mxu1 %vm395_vm0, %v863_v6  ;;  %v587_v37 = vld [vmem:[%s1183_s5] sm:$0x3]  ;;  %v987_v55 = vld [vmem:[%s1187_s9 + $0x8] sm:$0xff] }
  0x13   : > { %526 = vmatpush.bf16.msrb.mxu0 %v970_v4  ;;  %566 = vmatpush.bf16.msrb.mxu1 %v979_v10  ;;  %v980_v42 = vld [vmem:[%s1184_s6] sm:$0xff] }
  0x14   : > { %474 = vmatpush.bf16.msra.mxu2 %v974_v8  ;;  %508 = vmatpush.bf16.msra.mxu3 %v971_v9  ;;  %v984_v45 = vld [vmem:[%s1184_s6 + $0x20] sm:$0xff] }
  0x15   : > { %v986_v56 = vld [vmem:[%s1187_s9] sm:$0xff] }
  0x16   : > { %v998_v62 = vld [vmem:[%s1185_s7] ss:$0 sm:$0xff] }
  0x17   : > { %567 = vmatpush.bf16.msrb.mxu1 %v978_v11  ;;  %660 = vmatpush.bf16.msra.mxu0 %v983_v41  ;;  %v999_v1 = vld [vmem:[%s1186_s8] ss:$0 sm:$0xff] }
  0x1b   : > { %568 = vmatpush.bf16.msrb.mxu1 %v977_v12  ;;  %661 = vmatpush.bf16.msra.mxu0 %v982_v43 }
  0x1f   : > { %688 = vmatpush.bf16.msra.mxu1 %v981_v40 }
  0x22   : > { %898 = vmatmul.msk.bf16.vlgmr.msrb.gmra.mxu0 %vm395_vm0, %v897_v7  ;;  %v1000_v7 = vld [vmem:[%s1188_s10] ss:$0 sm:$0xff] }
  0x23   : > { %689 = vmatpush.bf16.msra.mxu1 %v980_v42  ;;  %789 = vmatpush.bf16.msrb.mxu0 %v987_v55 }
  0x27   : > { %790 = vmatpush.bf16.msrb.mxu0 %v986_v56 }
  0x8f   : > { %v408_v13 = vpop.f32.mrf.mxu0  ;;  %v433_v14 = vpop.f32.mrf.mxu1 }
  0x90   : > { %v412_v15 = vpack.c.bf16 %v408_v13, %v408_v13  ;;  %v437_v16 = vpack.c.bf16 %v433_v14, %v433_v14 }
  0x92   : > { %883 = vmatmul.msk.bf16.vlgmr.msra.gmra.mxu2 %vm463_vm1, %v437_v16  ;;  %896 = vmatmul.msk.bf16.vlgmr.msra.gmra.mxu3 %vm463_vm1, %v412_v15 }
  0x97   : > { %v410_v17 = vpop.f32.mrf.mxu0  ;;  %v435_v18 = vpop.f32.mrf.mxu1 }
  0x9f   : > { %v528_v19 = vpop.f32.mrf.mxu0 }
  0xa0   : > { %v532_v20 = vpack.c.bf16 %v528_v19, %v528_v19 }
  0xa2   : > { %917 = vmatmul.msk.bf16.vlgmr.msrb.gmra.mxu1 %vm463_vm1, %v532_v20 }
  0xa7   : > { %v530_v21 = vpop.f32.mrf.mxu0 }
 0x115   : > { %v476_v22 = vpop.f32.mrf.mxu2  ;;  %v510_v23 = vpop.f32.mrf.mxu3 }
 0x116   : > { %v511_v26 = vadd.f32 %v510_v23, %v476_v22 }
 0x11d   : > { %v478_v24 = vpop.f32.mrf.mxu2  ;;  %v512_v25 = vpop.f32.mrf.mxu3 }
 0x11f   : > { %v570_v28 = vpop.f32.mrf.mxu1 }
 0x120   : > { %v574_v29 = vadd.f32 %v570_v28, %v511_v26 }
 0x122   : > { %v579_v31 = vmul.f32 %v996_v27, %v574_v29 }
 0x124   : > { %v584_v32 = vadd.f32 %v997_v30, %v579_v31 }
 0x126   : > { %v585_v33 = vmax.f32 %v584_v32, 0.0 }
 0x127   : > { %v572_v34 = vpop.f32.mrf.mxu1 }
 0x128   : > { %v586_v35 = vpack.c.bf16 %v585_v33, %v585_v33 }
 0x12a   : > { %v594_v36 = vsel %vm592_vm2, %v586_v35, 0 }
 0x12b   : > { %603 = vmatpush.bf16.msrb.mxu2 %v594_v36  ;;  %626 = vmatpush.bf16.msrb.mxu3 %v594_v36 }
 0x12e   : > { %918 = vmatmul.msk.bf16.vlgmr.msrb.gmra.mxu2 %vm588_vm3, %v587_v37  ;;  %920 = vmatmul.msk.bf16.vlgmr.msrb.gmra.mxu3 %vm588_vm3, %v919_v38 }
 0x12f   : > { %707 = vmatpush.bf16.msra.mxu2 %v594_v36  ;;  %740 = vmatpush.bf16.msra.mxu3 %v985_v44 }
 0x133   : > { %741 = vmatpush.bf16.msra.mxu3 %v984_v45 }
 0x13e   : > { %944 = vmatmul.msk.bf16.vlgmr.msra.gmra.mxu2 %vm588_vm3, %v943_v39 }
 0x1b1   : > { %v605_v46 = vpop.f32.mrf.mxu2  ;;  %v628_v47 = vpop.f32.mrf.mxu3 }
 0x1b2   : > { %v609_v48 = vpack.c.bf16 %v605_v46, %v605_v46  ;;  %v632_v49 = vpack.c.bf16 %v628_v47, %v628_v47 }
 0x1b4   : > { %942 = vmatmul.msk.bf16.vlgmr.msra.gmra.mxu1 %vm650_vm4, %v609_v48  ;;  %933 = vmatmul.msk.bf16.vlgmr.msra.gmra.mxu0 %vm650_vm4, %v632_v49 }
 0x1b9   : > { %v607_v50 = vpop.f32.mrf.mxu2  ;;  %v630_v51 = vpop.f32.mrf.mxu3 }
 0x1c1   : > { %v709_v52 = vpop.f32.mrf.mxu2 }
 0x1c2   : > { %v713_v53 = vpack.c.bf16 %v709_v52, %v709_v52 }
 0x1c4   : > { %957 = vmatmul.msk.bf16.vlgmr.msra.gmra.mxu3 %vm650_vm4, %v713_v53 }
 0x1c9   : > { %v711_v54 = vpop.f32.mrf.mxu2 }
 0x231   : > { %v691_v57 = vpop.f32.mrf.mxu1  ;;  %v663_v58 = vpop.f32.mrf.mxu0 }
 0x232   : > { %v692_v61 = vadd.f32 %v691_v57, %v663_v58 }
 0x239   : > { %v693_v59 = vpop.f32.mrf.mxu1  ;;  %v665_v60 = vpop.f32.mrf.mxu0 }
 0x247   : > { %v743_v63 = vpop.f32.mrf.mxu3 }
 0x248   : > { %v747_v0 = vadd.f32 %v743_v63, %v692_v61 }
 0x24a   : > { %v752_v2 = vmul.f32 %v998_v62, %v747_v0 }
 0x24c   : > { %v757_v3 = vadd.f32 %v999_v1, %v752_v2 }
 0x24e   : > { %v758_v4 = vmax.f32 %v757_v3, 0.0 }
 0x24f   : > { %v745_v5 = vpop.f32.mrf.mxu3 }
 0x250   : > { %v759_v6 = vpack.c.bf16 %v758_v4, %v758_v4 }
 0x252   : > { %966 = vmatmul.msk.bf16.vlgmr.msrb.gmra.mxu0 %vm650_vm4, %v759_v6 }
 0x2cf   : > { %v792_v8 = vpop.f32.mrf.mxu0 }
 0x2d0   : > { %v793_v9 = vadd.f32 %v1000_v7, %v792_v8 }
 0x2d2   : > { %796 = vst [vmem:[%s384_s12] sm:$0xf] %v793_v9 }
 0x2d7   : > { %v794_v10 = vpop.f32.mrf.mxu0 }
 0x2d8 PF: > { %s21_s17 = sadd.s32 1, %s1007_s17  }
 0x2d9   : > { %p18_p4 = scmp.ge.s32.totalorder %s21_s17, 4  }
 0x2db   :  { %20 = sbr.rel (!%p18_p4) target bundleno = 1 (0x1), region = 102 }

</bundles_post_ra>
